<compile_context>
chip_gen: v7x
topology: tpu7x:2x2x1
jax: 0.10.0
libtpu: 0.0.40
codegen_flags: <defaults>
</compile_context>

<pallas_src>
import math
import functools

import jax
import jax.numpy as jnp
from jax import lax
from jax.experimental import pallas as pl
from jax.experimental.pallas import tpu as pltpu

_INV_SQRT2 = 1.0 / math.sqrt(2.0)
_SUBLANE_TILE = {4: 8, 2: 16, 1: 32}  # itemsize -> sublane packing tile


def _clipped_gelu_kernel(x_ref, o_ref, *, min_val, max_val):
    x = x_ref[...]
    # exact GELU: x * 0.5 * (1 + erf(x / sqrt(2)))  (torch.nn.functional.gelu default)
    xf = x.astype(jnp.float32)
    y = xf * 0.5 * (1.0 + lax.erf(xf * _INV_SQRT2))
    # Fused clip -> ClippedGELUActivation semantics (two VPU ops, no extra HBM pass).
    y = jnp.clip(y, min_val, max_val)
    o_ref[...] = y.astype(o_ref.dtype)


def _tpu_budget():
    """(per-buffer target bytes, vmem_limit_bytes, min blocks on the parallel axis)."""
    kind = ""
    try:
        kind = jax.devices()[0].device_kind.lower()
    except Exception:  # pragma: no cover - be robust off-TPU / at trace time
        pass
    if "v7" in kind:
        # v7x: only 64 MiB physical VMEM, but 2 TensorCores per chip.
        return 4 << 20, 48 << 20, 2
    # v5e / v6e: 128 MiB physical VMEM, 1 TensorCore.
    return 8 << 20, 96 << 20, 1


def _pick_block_rows(rows, cols, itemsize, target_bytes, min_blocks):
    """Rows per block: ~target_bytes per buffer, rounded to the dtype sublane tile,
    and never a single block on multi-TensorCore chips (so no core idles)."""
    sub = _SUBLANE_TILE.get(itemsize, 8)
    row_bytes = max(cols * itemsize, 1)
    target = max(sub, (target_bytes // row_bytes) // sub * sub)
    if target >= rows:
        if min_blocks > 1 and rows >= min_blocks * sub:
            per = -(-rows // min_blocks)          # ceil(rows / min_blocks)
            return -(-per // sub) * sub           # round up to sublane tile (< rows)
        return rows                               # single block covering the whole array
    return target


def _run_2d(x2d, min_val, max_val, donate_input=False):
    rows, cols = x2d.shape
    itemsize = x2d.dtype.itemsize
    target_bytes, vmem_limit, min_blocks = _tpu_budget()
    block_rows = _pick_block_rows(rows, cols, itemsize, target_bytes, min_blocks)
    grid = (pl.cdiv(rows, block_rows),)

    kernel = functools.partial(_clipped_gelu_kernel, min_val=min_val, max_val=max_val)
    nbytes = x2d.size * itemsize
    cost = pl.CostEstimate(
        flops=30 * x2d.size,            # erf polynomial + mul/add/clip chain
        transcendentals=x2d.size,
        bytes_accessed=2 * nbytes,      # read + write (the part that matters: mem-bound)
    )

    return pl.pallas_call(
        kernel,
        out_shape=jax.ShapeDtypeStruct((rows, cols), x2d.dtype),
        grid_spec=pl.GridSpec(
            grid=grid,
            # Last block dim == full array dim -> valid even when cols % 128 != 0.
            in_specs=[pl.BlockSpec((block_rows, cols), lambda i: (i, 0))],
            out_specs=pl.BlockSpec((block_rows, cols), lambda i: (i, 0)),
        ),
        compiler_params=pltpu.CompilerParams(
            dimension_semantics=("parallel",),
            vmem_limit_bytes=vmem_limit,
        ),
        cost_estimate=cost,
        input_output_aliases=({0: 0} if donate_input else {}),
    )(x2d)


def clipped_gelu_pallas(x, min_val=-10.0, max_val=10.0, donate_input=False):
    """clip(gelu(x), min_val, max_val) over an arbitrary-shaped array (defaults = gelu_10)."""
    orig_shape = x.shape
    if x.ndim == 0:
        x2d = x.reshape(1, 1)
    elif x.ndim == 1:
        n = x.shape[0]
        if n >= 1024 and n % 128 == 0:
            x2d = x.reshape(n // 128, 128)   # lane-dense layout for big 1-D inputs
        else:
            x2d = x.reshape(1, n)
    else:
        hidden = x.shape[-1]
        x2d = x.reshape(x.size // hidden, hidden)  # collapse leading dims, no copies
    out = _run_2d(x2d, min_val, max_val, donate_input)
    return out.reshape(orig_shape)


if __name__ == "__main__":
    key = jax.random.PRNGKey(0)
    k1, k2, k3 = jax.random.split(key, 3)

    def ref_clipped_gelu(x, lo, hi):
        g = x * 0.5 * (1.0 + lax.erf(x / math.sqrt(2.0)))
        return jnp.clip(g, lo, hi)

    # Scale inputs so |gelu(x)| exceeds 10 and the clip actually engages.

    # Lane-aligned hidden dim (batch=2, seq=8, hidden=128).
    x1 = 8.0 * jax.random.normal(k1, (2, 8, 128), dtype=jnp.float32)
    y1 = clipped_gelu_pallas(x1, -10.0, 10.0)
    jax.block_until_ready(y1)
    assert y1.shape == x1.shape and y1.dtype == x1.dtype
    assert jnp.allclose(y1, ref_clipped_gelu(x1, -10.0, 10.0), atol=1e-5, rtol=1e-5)
    assert float(jnp.max(y1)) <= 10.0 and float(jnp.min(y1)) >= -10.0

    # Non-lane-aligned hidden dim (batch=2, seq=8, hidden=32) — no pad/slice passes.
    x2 = 8.0 * jax.random.normal(k2, (2, 8, 32), dtype=jnp.float32)
    y2 = clipped_gelu_pallas(x2, -10.0, 10.0)
    jax.block_until_ready(y2)
    assert y2.shape == x2.shape and y2.dtype == x2.dtype
    assert jnp.allclose(y2, ref_clipped_gelu(x2, -10.0, 10.0), atol=1e-5, rtol=1e-5)

    # bf16 input (compute in f32, store bf16).
    x3 = (8.0 * jax.random.normal(k3, (2, 8, 96), dtype=jnp.float32)).astype(jnp.bfloat16)
    y3 = clipped_gelu_pallas(x3, -10.0, 10.0)
    jax.block_until_ready(y3)
    assert y3.shape == x3.shape and y3.dtype == x3.dtype
    ref3 = ref_clipped_gelu(x3.astype(jnp.float32), -10.0, 10.0)
    assert jnp.allclose(y3.astype(jnp.float32), ref3, atol=0.1, rtol=0.05)

    print("KERNEL_OK")
</pallas_src>

<mosaic_0001>
module attributes {stable_mosaic.version = 11 : i64} {
  func.func @_clipped_gelu_kernel(%arg0: i32, %arg1: memref<16x128xf32, #tpu.memory_space<vmem>>, %arg2: memref<16x128xf32, #tpu.memory_space<vmem>>) attributes {dimension_semantics = [#tpu.dimension_semantics<parallel>], iteration_bounds = array<i64: 1>, scalar_prefetch = 0 : i64, scratch_operands = 0 : i64, tpu.core_type = #tpu.core_type<tc>, window_params = [{transform_indices = @transform_0, window_bounds = array<i64: 16, 128>}, {transform_indices = @transform_1, window_bounds = array<i64: 16, 128>}]} {
    %c0 = arith.constant 0 : index
    %c0_0 = arith.constant 0 : index
    %0 = vector.load %arg1[%c0, %c0_0] : memref<16x128xf32, #tpu.memory_space<vmem>>, vector<16x128xf32>
    %cst = arith.constant 5.000000e-01 : f32
    %1 = vector.broadcast %cst : f32 to vector<16x128xf32>
    %2 = arith.mulf %0, %1 : vector<16x128xf32>
    %cst_1 = arith.constant 0.707106769 : f32
    %3 = vector.broadcast %cst_1 : f32 to vector<16x128xf32>
    %4 = arith.mulf %0, %3 : vector<16x128xf32>
    %5 = math.erf %4 : vector<16x128xf32>
    %cst_2 = arith.constant 1.000000e+00 : f32
    %6 = vector.broadcast %cst_2 : f32 to vector<16x128xf32>
    %7 = arith.addf %6, %5 : vector<16x128xf32>
    %8 = arith.mulf %2, %7 : vector<16x128xf32>
    %cst_3 = arith.constant -1.000000e+01 : f32
    %cst_4 = arith.constant 1.000000e+01 : f32
    %9 = vector.broadcast %cst_3 : f32 to vector<16x128xf32>
    %10 = arith.maximumf %9, %8 : vector<16x128xf32>
    %11 = vector.broadcast %cst_4 : f32 to vector<16x128xf32>
    %12 = arith.minimumf %11, %10 : vector<16x128xf32>
    %c0_5 = arith.constant 0 : index
    %c0_6 = arith.constant 0 : index
    %13 = vector.load %arg2[%c0_5, %c0_6] : memref<16x128xf32, #tpu.memory_space<vmem>>, vector<16x128xf32>
    tpu.vector_store %arg2[%c0_5, %c0_6], %12 {strides = array<i32>} : memref<16x128xf32, #tpu.memory_space<vmem>>, vector<16x128xf32>,
    return
  }
  func.func @transform_0(%arg0: i32) -> (i32, i32) {
    %c0_i32 = arith.constant 0 : i32
    %c0_i32_0 = arith.constant 0 : i32
    return %arg0, %c0_i32 : i32, i32
  }
  func.func @transform_1(%arg0: i32) -> (i32, i32) {
    %c0_i32 = arith.constant 0 : i32
    %c0_i32_0 = arith.constant 0 : i32
    return %arg0, %c0_i32 : i32, i32
  }
}

</mosaic_0001>

<bundles_post_ra>
// kernel: tpu_custom_call.1
= control target key start
LH: loop header
LB: loop body
LE: loop exit
PB: predicated region body
PF: predicated region fallthrough
CT: control target
= control target key end

     0   :  { %6 = vsyncpa [#allocation3], 0  ;;  %s160_s0 = inlined_call_operand.hbm [shape: f32[16,128], index: 0, kind: input, shape index: {}]   ;;  %s161_s1 = inlined_call_operand.hbm [shape: f32[16,128], index: 1, kind: output, shape index: {}]  }
   0x1   :  { %7 = vsyncpa [#allocation4], 0  ;;  %s116_s6 = smov [#allocation2]   ;;  %s68_s10 = scalar_lea.hbm %s160_s0, 256 }
   0x2   :  { %s13_s7 = sshll.u32 %s116_s6, 4  ;;  %p69_p0 = scmp.ne.s32.totalorder %s160_s0, %s68_s10  ;;  %s14_s7 = int_to_ptr.vmem [resolvable:$true] %s13_s7 }
   0x3   :  { %p72_p1 = scmp.lt.u32.totalorder %s68_s10, %s160_s0 }
   0x5   :  { %p74_p2 = pnand %p72_p1, %p69_p0 }
   0x7   :  { %77 = shalt.err (!%p74_p2)
}
   0x8   :  { %s78_s15 = scalar_lea.vmem %s14_s7, 256  ;;  %p83_p4 = scmp.lt.s32.totalorder %s14_s7, %s14_s7 }
   0x9   :  { %p79_p3 = scmp.ne.s32.totalorder %s14_s7, %s78_s15  ;;  %p84_p5 = scmp.lt.s32.totalorder %s78_s15, %s78_s15 }
   0xb   :  { %p85_p6 = por %p84_p5, %p83_p4 }
   0xd   :  { %p86_p7 = pnand %p85_p6, %p79_p3 }
   0xf   :  { %89 = shalt.err (!%p86_p7)
}
  0x10   :  { %s117_s16 = smov 128   ;;  %s118_s17 = smov 8  }
  0x11   :  { %19 = dma.hbm_to_vmem [thread:$0]  %s160_s0, 256, %s14_s7, [#allocation3], %s117_s16, %s117_s16, %s118_s17  }
  0x12   :  { %112 = dma.done.wait [#allocation3], 256  }
  0x13   :  { %113 = vsyncadd [#allocation3], 4294967040  ;;  %v23_v0 = vld [vmem:[#allocation2] sm:$0xff]  ;;  %v24_v1 = vld [vmem:[#allocation2 + $0x8] sm:$0xff]  ;;  %s119_s20 = smov [#allocation5]  }
  0x14   :  { %v27_v2 = vmul.f32 0.70710677, %v23_v0  ;;  %v28_v3 = vmul.f32 0.70710677, %v24_v1  ;;  %v25_v4 = vmul.f32 0.5, %v23_v0  ;;  %v26_v6 = vmul.f32 0.5, %v24_v1 }
  0x15   :  { %s46_s21 = sshll.u32 %s119_s20, 4  ;;  %s47_s21 = int_to_ptr.vmem [resolvable:$true] %s46_s21 }
  0x16   :  { %64 = verf.f32 %v27_v2  ;;  %s90_s0 = scalar_lea.vmem %s47_s21, 256  ;;  %p95_p9 = scmp.lt.s32.totalorder %s47_s21, %s47_s21 }
  0x17   :  { %66 = verf.f32 %v28_v3  ;;  %p91_p8 = scmp.ne.s32.totalorder %s47_s21, %s90_s0  ;;  %p96_p10 = scmp.lt.s32.totalorder %s90_s0, %s90_s0 }
  0x19   :  { %p97_p11 = por %p96_p10, %p95_p9 }
  0x1b   :  { %p98_p12 = pnand %p97_p11, %p91_p8 }
  0x20   :  { %v65_v5 = vpop.eup %64 }
  0x21   :  { %v67_v7 = vpop.eup %66  ;;  %v31_v8 = vadd.f32 1.0, %v65_v5 }
  0x22   :  { %v32_v9 = vadd.f32 1.0, %v67_v7 }
  0x23   :  { %v33_v10 = vmul.f32 %v31_v8, %v25_v4 }
  0x24   :  { %v34_v11 = vmul.f32 %v32_v9, %v26_v6 }
  0x25   :  { %v58_v12 = vclamps-f32 %v33_v10, 10.0 }
  0x26   :  { %v59_v13 = vclamps-f32 %v34_v11, 10.0 }
  0x27   :  { %39 = vst [vmem:[#allocation5] sm:$0xff] %v58_v12 }
  0x28   :  { %40 = vst [vmem:[#allocation5 + $0x8] sm:$0xff] %v59_v13 }
  0x29   :  { %101 = shalt.err (!%p98_p12)
}
  0x2a   :  { %s102_s24 = scalar_lea.hbm %s161_s1, 256 }
  0x2b   :  { %p103_p13 = scmp.ne.s32.totalorder %s161_s1, %s102_s24  ;;  %p106_p0 = scmp.lt.u32.totalorder %s102_s24, %s161_s1 }
  0x2d   :  { %p108_p1 = pnand %p106_p0, %p103_p13 }
  0x2f   :  { %111 = shalt.err (!%p108_p1)
}
  0x30   :  { %52 = dma.vmem_to_hbm [thread:$0]  %s47_s21, 256, %s161_s1, [#allocation4], %s117_s16, %s117_s16, %s118_s17  }
  0x31   :  { %114 = dma.done.wait [#allocation4], 256  }
  0x32   :  { %115 = vsyncadd [#allocation4], 4294967040 }
  0x33   :  { %56 = vsyncpa [#allocation3], 1 }
  0x34   :  { %57 = vsyncpa [#allocation4], 1 }

</bundles_post_ra>
